<compile_context>
chip_gen: v7x
topology: tpu7x:2x2x1
jax: 0.10.0
libtpu: 0.0.40
codegen_flags: <defaults>
</compile_context>

<pallas_src>
import numpy as np
import jax
import jax.numpy as jnp
from jax.experimental import pallas as pl
from jax.experimental.pallas import tpu as pltpu

NBINS = 256
_TP_MAX = 32768   # pixel-tile (lane) cap; multiple of 128


def _make_kernel(tp, ntc, n_pixels, need_mask):
    """Per-(core-split, batch, pixel-tile) histogram step."""

    def kernel(x_ref, acc_ref):
        p = pl.program_id(2)

        @pl.when(p == 0)
        def _init():
            acc_ref[...] = jnp.zeros_like(acc_ref)

        x = x_ref[0].astype(jnp.float32)                       # (3, tp)

        # np.histogram(x*255, 256, range=[0,255]) bin index == floor(x*256),
        # right edge (x == 1.0) folded into bin 255.  Out-of-range values get
        # hi outside 0..15 below and are dropped.
        idx = jnp.floor(x * float(NBINS)).astype(jnp.int32)
        idx = jnp.where(x == 1.0, NBINS - 1, idx)

        if need_mask:
            # Ragged last tile: lanes past the image's pixel count hold
            # unspecified data; force them out of range (applied after the
            # x==1.0 fold so garbage never lands in a real bin).
            tile = pl.program_id(0) * ntc + p
            lane = jax.lax.broadcasted_iota(jnp.int32, (1, tp), 1)
            idx = jnp.where(lane < (n_pixels - tile * tp), idx, -1)

        hi = jax.lax.shift_right_arithmetic(idx, 4).astype(jnp.bfloat16)  # (3, tp)
        lo = jnp.bitwise_and(idx, 15).astype(jnp.bfloat16)                # (3, tp)

        # bf16 one-hots against a tiny (1,16,1) iota, broadcast over channels
        # and lanes; bins on sublanes, pixels on lanes => dense vregs.
        # hi/lo values 0..15 (and the dropped out-of-range ones) are exact in
        # bf16, so equality is exact.
        bins = jax.lax.broadcasted_iota(jnp.int32, (1, 16, 1), 1).astype(jnp.bfloat16)
        hi_oh = (hi[:, None, :] == bins).astype(jnp.bfloat16)   # (3, 16, tp)
        lo_oh = (lo[:, None, :] == bins).astype(jnp.bfloat16)   # (3, 16, tp)

        # Fuse the 3 channels into one MXU contraction over the pixel axis:
        #   counts[16c+h, 16c'+l] = sum_p hi_oh[c,h,p] * lo_oh[c',l,p]
        # The channel-diagonal 16x16 blocks are the per-channel histograms
        # (bin = 16*h + l); off-diagonal cross-channel blocks are discarded in
        # the wrapper.  0/1 bf16 inputs + f32 accumulation -> exact counts.
        hi48 = hi_oh.reshape(3 * 16, tp)
        lo48 = lo_oh.reshape(3 * 16, tp)
        counts = jax.lax.dot_general(
            hi48, lo48,
            dimension_numbers=(((1,), (1,)), ((), ())),
            preferred_element_type=jnp.float32)                 # (48, 48)

        acc_ref[...] += counts[None, None]

    return kernel


def get_histogram(x, *, tp_max=_TP_MAX):
    """x: (B, 3, H, W) array with values nominally in [0, 1].

    Returns (hist_r, count_r, count_g, count_b) matching the PyTorch module:
      hist_r  = (R-channel histogram of the LAST batch element, bin_edges)
      count_c = histogram of channel c summed over the whole batch.
    Counts are exact integers carried in float32.
    """
    B, C, H, W = x.shape
    assert C == 3, "get_histogram expects RGB input (C == 3)"
    assert tp_max >= 128 and tp_max % 128 == 0
    P = H * W
    xf = jnp.asarray(x).reshape(B, C, P)

    # Pixel tiling: one full-width tile if the image fits (any lane count is
    # legal when the block spans the full axis), otherwise 128-aligned tiles
    # with the ragged tail masked in-kernel (no jnp.pad HBM copy).
    if P <= tp_max:
        tp, n_tiles = P, 1
    else:
        tp, n_tiles = tp_max, pl.cdiv(P, tp_max)

    # Core-split axis so a single-image call still fills both v7x TensorCores;
    # only used when the tile count splits evenly (no overflow steps needed).
    ncore = 2 if (B == 1 and n_tiles >= 2 and n_tiles % 2 == 0) else 1
    ntc = n_tiles // ncore
    need_mask = (n_tiles * tp != P)

    kernel = _make_kernel(tp, ntc, P, need_mask)

    acc = pl.pallas_call(
        kernel,
        out_shape=jax.ShapeDtypeStruct((ncore, B, 48, 48), jnp.float32),
        grid_spec=pltpu.PrefetchScalarGridSpec(
            num_scalar_prefetch=0,
            grid=(ncore, B, ntc),
            in_specs=[pl.BlockSpec((1, C, tp),
                                   lambda s, b, p: (b, 0, s * ntc + p))],
            out_specs=pl.BlockSpec((1, 1, 48, 48),
                                   lambda s, b, p: (s, b, 0, 0)),
        ),
        compiler_params=pltpu.CompilerParams(
            dimension_semantics=("parallel", "parallel", "arbitrary"),
            vmem_limit_bytes=64 << 20),
    )(xf)

    # (ncore, B, 48, 48) -> per-image 256-bin histograms.  Per-bin counts are
    # exact in f32 up to 2^24 pixels per image; the batch sum runs in int32 so
    # totals stay exact up to 2^31.
    per_image = acc.sum(axis=0)                                  # (B, 48, 48)
    per_image = jnp.stack(
        [per_image[:, 16 * c:16 * (c + 1), 16 * c:16 * (c + 1)] for c in range(3)],
        axis=1).reshape(B, 3, NBINS)
    totals = per_image.astype(jnp.int32).sum(axis=0).astype(jnp.float32)

    bin_edges = jnp.linspace(0.0, 255.0, NBINS + 1)
    hist_r = (per_image[B - 1, 0], bin_edges)    # last batch element, R channel
    # TODO(synk): numpy returns int64 counts / float64 edges; we keep exact
    # float32.  Bin indices are computed in f32 (floor(x*256)) vs numpy's f64,
    # so values exactly on a bin edge can land one bin off.
    return hist_r, totals[0], totals[1], totals[2]


if __name__ == "__main__":
    def _ref_counts(xn):
        xn = np.asarray(xn, dtype=np.float64)
        ref = np.zeros((xn.shape[0], 3, NBINS))
        for j in range(xn.shape[0]):
            for c in range(3):
                ref[j, c] = np.histogram(xn[j, c] * 255.0, NBINS, range=[0, 255])[0]
        return ref

    def _check(x, **kw):
        hist_r, count_r, count_g, count_b = get_histogram(x, **kw)
        jax.block_until_ready((hist_r[0], hist_r[1], count_r, count_g, count_b))
        ref = _ref_counts(np.asarray(x))
        got = np.stack([np.asarray(count_r), np.asarray(count_g), np.asarray(count_b)])
        # Allow off-by-one per bin for f32-vs-f64 bin-edge rounding.
        assert np.abs(got - ref.sum(0)).max() <= 1.0
        assert np.abs(np.asarray(hist_r[0]) - ref[-1, 0]).max() <= 1.0
        assert hist_r[1].shape == (NBINS + 1,)

    key = jax.random.PRNGKey(0)

    # Single full-width tile per image; right-edge / out-of-range edge cases.
    x = jax.random.uniform(key, (2, 3, 16, 16), dtype=jnp.float32)   # [0, 1)
    x = x.at[0, 0, 0, 0].set(1.0)     # right edge -> bin 255
    x = x.at[0, 1, 0, 0].set(1.5)     # out of range -> dropped
    x = x.at[0, 2, 0, 0].set(-0.25)   # out of range -> dropped
    _check(x)

    # Multi-tile path with ragged (in-kernel masked) tail: P = 17*17 = 289.
    x2 = jax.random.uniform(jax.random.PRNGKey(0), (2, 3, 17, 17), dtype=jnp.float32)
    _check(x2, tp_max=128)

    # B == 1: core-split axis + ragged tail: P = 400 -> 4 tiles of 128, 2/core.
    x3 = jax.random.uniform(jax.random.PRNGKey(0), (1, 3, 20, 20), dtype=jnp.float32)
    _check(x3, tp_max=128)

    print("KERNEL_OK")
</pallas_src>

<mosaic_0001>
module attributes {stable_mosaic.version = 11 : i64} {
  func.func @kernel(%arg0: i32, %arg1: i32, %arg2: i32, %arg3: memref<1x3x256xf32, #tpu.memory_space<vmem>>, %arg4: memref<1x1x48x48xf32, #tpu.memory_space<vmem>>) attributes {dimension_semantics = [#tpu.dimension_semantics<parallel>, #tpu.dimension_semantics<parallel>, #tpu.dimension_semantics<arbitrary>], iteration_bounds = array<i64: 1, 2, 1>, scalar_prefetch = 0 : i64, scratch_operands = 0 : i64, tpu.core_type = #tpu.core_type<tc>, window_params = [{transform_indices = @transform_0, window_bounds = array<i64: 1, 3, 256>}, {transform_indices = @transform_1, window_bounds = array<i64: 1, 1, 48, 48>}]} {
    %c0_i32 = arith.constant 0 : i32
    %0 = arith.cmpi eq, %arg2, %c0_i32 : i32
    %1 = arith.extui %0 : i1 to i32
    %c0_i32_0 = arith.constant 0 : i32
    %2 = arith.cmpi ne, %1, %c0_i32_0 : i32
    scf.if %2 {
      %cst_13 = arith.constant 0.000000e+00 : f32
      %42 = vector.broadcast %cst_13 : f32 to vector<1x1x48x48xf32>
      %c0_14 = arith.constant 0 : index
      %c0_15 = arith.constant 0 : index
      %c0_16 = arith.constant 0 : index
      %c0_17 = arith.constant 0 : index
      %43 = vector.load %arg4[%c0_14, %c0_15, %c0_16, %c0_17] : memref<1x1x48x48xf32, #tpu.memory_space<vmem>>, vector<1x1x48x48xf32>
      tpu.vector_store %arg4[%c0_14, %c0_15, %c0_16, %c0_17], %42 {strides = array<i32>} : memref<1x1x48x48xf32, #tpu.memory_space<vmem>>, vector<1x1x48x48xf32>,
    } else {
    }
    %c0 = arith.constant 0 : index
    %c0_1 = arith.constant 0 : index
    %c0_2 = arith.constant 0 : index
    %3 = vector.load %arg3[%c0, %c0_1, %c0_2] : memref<1x3x256xf32, #tpu.memory_space<vmem>>, vector<1x3x256xf32>
    %4 = vector.shape_cast %3 : vector<1x3x256xf32> to vector<3x256xf32>
    %cst = arith.constant 2.560000e+02 : f32
    %5 = vector.broadcast %cst : f32 to vector<3x256xf32>
    %6 = arith.mulf %4, %5 : vector<3x256xf32>
    %7 = math.floor %6 : vector<3x256xf32>
    %8 = arith.fptosi %7 : vector<3x256xf32> to vector<3x256xi32>
    %cst_3 = arith.constant 1.000000e+00 : f32
    %9 = vector.broadcast %cst_3 : f32 to vector<3x256xf32>
    %10 = arith.cmpf oeq, %4, %9 : vector<3x256xf32>
    %c255_i32 = arith.constant 255 : i32
    %11 = vector.broadcast %c255_i32 : i32 to vector<3x256xi32>
    %12 = arith.select %10, %11, %8 : vector<3x256xi1>, vector<3x256xi32>
    %c4_i32 = arith.constant 4 : i32
    %13 = vector.broadcast %c4_i32 : i32 to vector<3x256xi32>
    %14 = arith.shrsi %12, %13 : vector<3x256xi32>
    %15 = arith.sitofp %14 : vector<3x256xi32> to vector<3x256xbf16>
    %c15_i32 = arith.constant 15 : i32
    %16 = vector.broadcast %c15_i32 : i32 to vector<3x256xi32>
    %17 = arith.andi %12, %16 : vector<3x256xi32>
    %18 = arith.sitofp %17 : vector<3x256xi32> to vector<3x256xbf16>
    %19 = tpu.iota {dimensions = array<i32: 1>} : vector<1x16x1xi32>
    %20 = arith.sitofp %19 : vector<1x16x1xi32> to vector<1x16x1xbf16>
    %21 = vector.shape_cast %15 : vector<3x256xbf16> to vector<3x1x256xbf16>
    %22 = vector.broadcast %21 : vector<3x1x256xbf16> to vector<3x16x256xbf16>
    %23 = vector.broadcast %20 : vector<1x16x1xbf16> to vector<3x16x256xbf16>
    %24 = arith.cmpf oeq, %22, %23 : vector<3x16x256xbf16>
    %25 = arith.extui %24 : vector<3x16x256xi1> to vector<3x16x256xi32>
    %26 = arith.sitofp %25 : vector<3x16x256xi32> to vector<3x16x256xf32>
    %27 = arith.truncf %26 : vector<3x16x256xf32> to vector<3x16x256xbf16>
    %28 = vector.shape_cast %18 : vector<3x256xbf16> to vector<3x1x256xbf16>
    %29 = vector.broadcast %28 : vector<3x1x256xbf16> to vector<3x16x256xbf16>
    %30 = vector.broadcast %20 : vector<1x16x1xbf16> to vector<3x16x256xbf16>
    %31 = arith.cmpf oeq, %29, %30 : vector<3x16x256xbf16>
    %32 = arith.extui %31 : vector<3x16x256xi1> to vector<3x16x256xi32>
    %33 = arith.sitofp %32 : vector<3x16x256xi32> to vector<3x16x256xf32>
    %34 = arith.truncf %33 : vector<3x16x256xf32> to vector<3x16x256xbf16>
    %35 = vector.shape_cast %27 : vector<3x16x256xbf16> to vector<48x256xbf16>
    %36 = vector.shape_cast %34 : vector<3x16x256xbf16> to vector<48x256xbf16>
    %cst_4 = arith.constant dense<0.000000e+00> : vector<48x48xf32>
    %37 = tpu.matmul %35, %36, %cst_4 {dimension_numbers = #tpu.dot_dimension_numbers<[1], [1], [0], [0], [0, 0, 1, 0], [], []>} : vector<48x256xbf16>, vector<48x256xbf16>, vector<48x48xf32> -> vector<48x48xf32>
    %c0_5 = arith.constant 0 : index
    %c0_6 = arith.constant 0 : index
    %c0_7 = arith.constant 0 : index
    %c0_8 = arith.constant 0 : index
    %38 = vector.load %arg4[%c0_5, %c0_6, %c0_7, %c0_8] : memref<1x1x48x48xf32, #tpu.memory_space<vmem>>, vector<1x1x48x48xf32>
    %39 = vector.shape_cast %37 : vector<48x48xf32> to vector<1x1x48x48xf32>
    %40 = arith.addf %38, %39 : vector<1x1x48x48xf32>
    %c0_9 = arith.constant 0 : index
    %c0_10 = arith.constant 0 : index
    %c0_11 = arith.constant 0 : index
    %c0_12 = arith.constant 0 : index
    %41 = vector.load %arg4[%c0_9, %c0_10, %c0_11, %c0_12] : memref<1x1x48x48xf32, #tpu.memory_space<vmem>>, vector<1x1x48x48xf32>
    tpu.vector_store %arg4[%c0_9, %c0_10, %c0_11, %c0_12], %40 {strides = array<i32>} : memref<1x1x48x48xf32, #tpu.memory_space<vmem>>, vector<1x1x48x48xf32>,
    return
  }
  func.func @transform_0(%arg0: i32, %arg1: i32, %arg2: i32) -> (i32, i32, i32) {
    %c1_i32 = arith.constant 1 : i32
    %0 = arith.muli %arg0, %c1_i32 : i32
    %1 = arith.addi %0, %arg2 : i32
    %c0_i32 = arith.constant 0 : i32
    %c0_i32_0 = arith.constant 0 : i32
    return %arg1, %c0_i32, %1 : i32, i32, i32
  }
  func.func @transform_1(%arg0: i32, %arg1: i32, %arg2: i32) -> (i32, i32, i32, i32) {
    %c0_i32 = arith.constant 0 : i32
    %c0_i32_0 = arith.constant 0 : i32
    %c0_i32_1 = arith.constant 0 : i32
    return %arg0, %arg1, %c0_i32, %c0_i32_0 : i32, i32, i32, i32
  }
}

</mosaic_0001>

<bundles_post_ra>
// kernel: tpu_custom_call.1
= control target key start
LH: loop header
LB: loop body
LE: loop exit
PB: predicated region body
PF: predicated region fallthrough
CT: control target
= control target key end

     0   :  { %6 = vsyncpa [#allocation3], 0  ;;  %s1443_s0 = inlined_call_operand.hbm [shape: f32[2,3,256], index: 0, kind: input, shape index: {}]   ;;  %s1444_s1 = inlined_call_operand.hbm [shape: f32[1,2,48,48], index: 1, kind: output, shape index: {}]  }
   0x1   :  { %8 = vsyncpa [#allocation3 + $0x1], 0 }
   0x2   :  { %9 = vsyncpa [#allocation4], 0 }
   0x3   :  { %11 = vsyncpa [#allocation4 + $0x1], 0  ;;  %s1061_s6 = smov 0   ;;  %s1063_s7 = smov 0  }
   0x4   :  { %s1065_s8 = smov 0   ;;  %s1067_s9 = smov 0  }
   0x5   :  { %s1069_s10 = smov 0   ;;  %s1071_s11 = smov 0  }
   0x6 LB: > { %s772_s12 = sadd.s32 4294967295, %s1041_s11   ;;  %s773_s13 = sadd.s32 4294967294, %s1041_s11   ;;  %s1041_s11 = sphi %s1071_s11, %s17_s11   ;;  %s1037_s10 = sphi %s1069_s10, %s1480_s10   ;;  %s1033_s9 = sphi %s1067_s9, %s1479_s9   ;;  %s1029_s8 = sphi %s1065_s8, %s1478_s8   ;;  %s1025_s7 = sphi %s1063_s7, %s1477_s7   ;;  %s1021_s6 = sphi %s1061_s6, %s1476_s6  }
   0x7   : > { %s32_s14 = sadd.s32 1, %s1037_s10  ;;  %s47_s15 = sadd.s32 1, %s1029_s8 }
   0x8   : > { %p34_p0 = scmp.ge.s32.totalorder %s32_s14, 2  ;;  %p54_p1 = scmp.ne.s32.totalorder %s1029_s8, %s1025_s7 }
   0x9   : > { %p55_p2 = scmp.eq.s32.totalorder %s1041_s11, 0  ;;  %p60_p3 = scmp.ne.s32.totalorder %s1025_s7, %s1021_s6 }
   0xa   : > { %s1482_s14 = smov (%p34_p0, %s32_s14), 0  ;;  %p61_p5 = scmp.eq.s32.totalorder %s772_s12, 0 }
   0xb   : > { %p1102_p4 = por %p55_p2, %p54_p1  ;;  %s42_s17 = ssub.s32 %s1037_s10, %s1482_s14 }
   0xc   : > { %p86_p6 = scmp.eq.s32.totalorder %s772_s12, 1  ;;  %p45_p7 = scmp.eq.s32.totalorder %s42_s17, 0 }
   0xd   : > { %p1108_p8 = por %p61_p5, %p60_p3  ;;  %p92_p10 = scmp.eq.s32.totalorder %s773_s13, 1 }
   0xe   : > { %p1112_p9 = por %p86_p6, %p54_p1  ;;  %p873_p13 = scmp.lt.s32.totalorder %s1041_s11, 2 }
   0xf   : > { %s1117_s20 = scalar_select %p45_p7, %s1029_s8, %s47_s15  }
  0x10   : > { %s1448_s19 = scalar_select %p1112_p9, 1, 0 }
  0x11   : > { %p1119_p11 = por %p92_p10, %p60_p3  ;;  %s112_s22 = sand.u32 1, %s1029_s8  }
  0x12   : > { %s776_s23 = sshll.u32 %s112_s22, 3  ;;  %s850_s24 = sshll.u32 %s1037_s10, 7 }
  0x13   : > { %s1449_s21 = scalar_select %p1119_p11, 1, 0 }
  0x14   : > { %s1130_s27 = scalar_lea.hbm %s1443_s0, %s850_s24  ;;  %s116_s28 = scalar_lea.vmem [#allocation2], %s776_s23 }
  0x15   : > { %s127_s29 = sshll.u32 %s116_s28, 4  ;;  %p1136_p0 = pnand %p873_p13, %p1102_p4  ;;  %s1132_s29 = int_to_ptr.vmem [resolvable:$true] %s127_s29 }
  0x16   : > { %s113_s2 = scalar_lea.sflag [#allocation3], %s112_s22  ;;  %s929_s3 = scalar_lea.hbm %s1130_s27, 128 }
  0x17   : > { %p930_p3 = scmp.ne.s32.totalorder %s1130_s27, %s929_s3  ;;  %p931_p5 = pneg %p1136_p0 }
  0x18   : > { %s934_s12 = scalar_lea.hbm %s1443_s0, 256  ;;  %p935_p4 = scmp.lt.u32.totalorder %s1130_s27, %s1443_s0 }
  0x19   : > { %p932_p6 = pnand %p931_p5, %p930_p3  ;;  %p936_p10 = scmp.lt.u32.totalorder %s934_s12, %s929_s3 }
  0x1a   : > { %p938_p12 = scmp.lt.u32.totalorder %s929_s3, %s1130_s27 }
  0x1b   : > { %p933_p7 = pneg %p932_p6  ;;  %p937_p13 = por %p936_p10, %p935_p4 }
  0x1d   : > { %p939_p1 = por %p938_p12, %p937_p13 }
  0x1f   : > { %p940_p2 = pnand %p939_p1, %p933_p7 }
  0x21   : > { %943 = shalt.err (!%p940_p2)
}
  0x22   : > { %s944_s16 = scalar_lea.vmem %s1132_s29, 128  ;;  %s1043_s17 = smov [#allocation2]  }
  0x23   : > { %p945_p3 = scmp.ne.s32.totalorder %s1132_s29, %s944_s16  ;;  %s949_s22 = sshll.u32 %s1043_s17, 4  ;;  %s950_s22 = int_to_ptr.vmem [resolvable:$false] %s949_s22 }
  0x24   : > { %s951_s23 = scalar_lea.vmem %s950_s22, 256  ;;  %p952_p9 = scmp.lt.s32.totalorder %s1132_s29, %s950_s22 }
  0x25   : > { %p947_p6 = pnand %p945_p3, %p931_p5  ;;  %p953_p4 = scmp.lt.s32.totalorder %s951_s23, %s944_s16 }
  0x27   : > { %p948_p11 = pneg %p947_p6  ;;  %p954_p10 = por %p953_p4, %p952_p9 }
  0x29   : > { %p955_p12 = pnand %p954_p10, %p948_p11 }
  0x2b   : > { %958 = shalt.err (!%p955_p12)
}
  0x2c   : > { %868 = dma.hbm_to_vmem [thread:$0]  (!%p1136_p0), %s1130_s27, 128, %s1132_s29, %s113_s2  }
  0x2d   : > { %p1451_p1 = scmp.lt.s32.totalorder %s1041_s11, 3  ;;  %p1452_p2 = scmp.ge.s32.totalorder %s1041_s11, 1 }
  0x2f   : > { %p133_p5 = pnand %p1452_p2, %p1451_p1 }
  0x30   : > { %s1172_s24 = sand.u32 (!%p133_p5), 1, %s1025_s7  }
  0x31   : > { %136 = sbr.rel (%p133_p5) target bundleno = 360 (0x168), region = 24  ;;  %s780_s25 = sshll.u32 (!%p133_p5), %s1172_s24, 3 }
  0x32   : > { %s139_s26 = scalar_lea.sflag (!%p133_p5), [#allocation3], %s1172_s24  ;;  %s142_s28 = scalar_lea.vmem (!%p133_p5), [#allocation2], %s780_s25 }
  0x38   : > { %1012 = dma.done.wait (%p1108_p8), %s139_s26, 128  }
  0x39   : > { %1014 = vsyncadd (%p1108_p8), %s139_s26, 4294967168  ;;  %s857_s27 = smul.u32 48, %s1172_s24  ;;  %vm170_vm0 = vcmask 392192   ;;  %v1044_v0 = vmov 0.0   ;;  %v177_v1 = vld [vmem:[%s142_s28] sm:$0x77]  ;;  %v197_v5 = vlaneseq }
  0x3a   : > { %v178_v2 = vmul.f32 256.0, %v177_v1  ;;  %vm181_vm1 = vcmp.eq.f32.partialorder %v177_v1, 1.0  ;;  %v1045_v6 = vmov 1966171168   ;;  %v1046_v63 = vmov 0   ;;  %s860_s18 = smul.u32 768, %s1033_s9 }
  0x3b   : > { %s1181_s29 = scalar_lea.vmem [#allocation5], %s857_s27  ;;  %v207_v7 = vunpack.c.l.s4 %v1045_v6  ;;  %v198_v11 = vshrl.u32 %v197_v5, 7  ;;  %s666_s9 = scalar_lea.sflag [#allocation4], %s1172_s24 }
  0x3c   : > { %173 = vst.msk [vmem:[%s1181_s29 + $0x10] sm:$0xff] %vm170_vm0, %v1044_v0  ;;  %171 = vst.msk [vmem:[%s1181_s29] sm:$0xff] %vm170_vm0, %v1044_v0  ;;  %v179_v3 = vfloor.f32 %v178_v2  ;;  %s681_s30 = sshll.u32 %s1181_s29, 4  ;;  %s1388_s4 = scalar_lea.hbm %s1444_s1, %s860_s18  ;;  %s1390_s30 = int_to_ptr.vmem [resolvable:$true] %s681_s30 }
  0x3d   : > { %172 = vst.msk [vmem:[%s1181_s29 + $0x8] sm:$0xff] %vm170_vm0, %v1044_v0  ;;  %174 = vst.msk [vmem:[%s1181_s29 + $0x18] sm:$0xff] %vm170_vm0, %v1044_v0  ;;  %v208_v12 = vunpack.c.0.s8 %v207_v7  ;;  %v199_v21 = vadd.s32 8, %v198_v11  ;;  %v1195_v24 = vsub.s32 0, %v198_v11  ;;  %v1197_v25 = vsub.s32 1, %v198_v11  ;;  %s959_s5 = scalar_lea.vmem %s1390_s30, 768 }
  0x3e   : > { %175 = vst.msk [vmem:[%s1181_s29 + $0x20] sm:$0xff] %vm170_vm0, %v1044_v0  ;;  %176 = vst.msk [vmem:[%s1181_s29 + $0x28] sm:$0xff] %vm170_vm0, %v1044_v0  ;;  %v858_v4 = vtrunc.f32 %v179_v3  ;;  %v200_v29 = vcvt.s32.f32 %v198_v11  ;;  %p960_p8 = scmp.ne.s32.totalorder %s1390_s30, %s959_s5  ;;  %p1473_p9 = scmp.ne.s32.totalorder %s1448_s19, 0 }
  0x3f   : > { %v211_v17 = vsub.s32 %v208_v12, %v198_v11  ;;  %v201_v30 = vcvt.s32.f32 %v199_v21  ;;  %s1048_s12 = smov [#allocation5]  }
  0x40   : > { %v859_v8 = vcvt.f32.s32 %v858_v4  ;;  %p961_p11 = pnand %p960_p8, %p1473_p9  ;;  %s963_s13 = sshll.u32 %s1048_s12, 4  ;;  %s964_s13 = int_to_ptr.vmem [resolvable:$false] %s963_s13 }
  0x41   : > { %v1203_v41 = vpack.c.bf16 %v201_v30, %v200_v29  ;;  %s965_s15 = scalar_lea.vmem %s964_s13, 1536  ;;  %p966_p7 = scmp.lt.s32.totalorder %s1390_s30, %s964_s13 }
  0x42   : > { %v182_v9 = vsel %vm181_vm1, 255, %v859_v8  ;;  %p962_p0 = pneg %p961_p11  ;;  %p967_p13 = scmp.lt.s32.totalorder %s965_s15, %s959_s5 }
  0x43   : > { %v190_v10 = vand.u32 15, %v182_v9  ;;  %v183_v13 = vshra.s32 %v182_v9, 4 }
  0x44   : > { %p968_p3 = por %p967_p13, %p966_p7 }
  0x45   : > { %v191_v14 = vcvt.s32.f32 %v190_v10  ;;  %v184_v15 = vcvt.s32.f32 %v183_v13 }
  0x46   : > { %p969_p6 = pnand %p968_p3, %p962_p0 }
  0x47   : > { %v193_v16 = vcombine.high %v191_v14, %v191_v14  ;;  %v186_v18 = vcombine.high %v184_v15, %v184_v15 }
  0x49   : > { %v802_v19 = vpack.c.bf16 %v193_v16, %v191_v14  ;;  %v781_v20 = vpack.c.bf16 %v186_v18, %v184_v15 }
  0x4b   : > { %v405_v22 = vrot.slane %v802_v19, %v211_v17  ;;  %v212_v23 = vrot.slane %v781_v20, %v211_v17 }
  0x4d   : > { %v413_v26 = vrot.slane %v405_v22, %v211_v17  ;;  %v406_v27 = vcombine.high %v405_v22, %v405_v22  ;;  %v220_v28 = vrot.slane %v212_v23, %v211_v17  ;;  %v213_v31 = vcombine.high %v212_v23, %v212_v23 }
  0x4f   : > { %v803_v32 = vpack.i.b16 %v413_v26, %v413_v26  ;;  %v422_v33 = vunpack.i.h.s16 %v413_v26  ;;  %v420_v34 = vrot.slane %v406_v27, %v211_v17  ;;  %v229_v35 = vunpack.i.h.s16 %v220_v28 }
  0x50   : > { %v1199_v36 = vpack.i.b16 %v220_v28, %v220_v28  ;;  %v1209_v44 = vrot.slane %v213_v31, %v211_v17  ;;  %v1047_v26 = vmov 1.0|1.0  }
  0x51   : > { %v430_v37 = vrot.slane %v803_v32, %v1195_v24  ;;  %v434_v38 = vrot.slane %v803_v32, %v1197_v25  ;;  %v425_v39 = vpack.i.b16 %v422_v33, %v422_v33  ;;  %v804_v40 = vpack.i.b16 %v420_v34, %v420_v34 }
  0x52   : > { %v232_v42 = vpack.i.b16 %v229_v35, %v229_v35  ;;  %v1207_v43 = vrot.slane %v1199_v36, %v1195_v24  ;;  %v241_v35 = vrot.slane %v1199_v36, %v1197_v25 }
  0x53   : > { %v452_v45 = vpack.i.b16 %v430_v37, %v430_v37  ;;  %v459_v46 = vpack.i.b16 %v434_v38, %v434_v38  ;;  %v438_v47 = vrot.slane %v425_v39, %v1195_v24  ;;  %v442_v48 = vrot.slane %v425_v39, %v1197_v25 }
  0x54   : > { %v446_v49 = vrot.slane %v804_v40, %v1195_v24  ;;  %v450_v50 = vrot.slane %v804_v40, %v1197_v25  ;;  %v1216_v51 = vrot.slane %v232_v42, %v1195_v24  ;;  %v1219_v52 = vrot.slane %v232_v42, %v1197_v25 }
  0x55   : > { %v457_v53 = vrot.slane %v452_v45, %v1195_v24  ;;  %v464_v54 = vrot.slane %v459_v46, %v1195_v24  ;;  %v466_v55 = vpack.i.b16 %v438_v47, %v438_v47  ;;  %v473_v56 = vpack.i.b16 %v442_v48, %v442_v48 }
  0x56   : > { %v480_v57 = vpack.i.b16 %v446_v49, %v446_v49  ;;  %v487_v58 = vpack.i.b16 %v450_v50, %v450_v50  ;;  %v273_v59 = vpack.i.b16 %v1216_v51, %v1216_v51  ;;  %v280_v60 = vpack.i.b16 %v1219_v52, %v1219_v52 }
  0x57   : > { %vm493_vm2 = vcmp.eq.bf16.partialorder %v457_v53, %v1203_v41  ;;  %vm494_vm3 = vcmp.eq.bf16.partialorder %v464_v54, %v1203_v41  ;;  %v471_v61 = vrot.slane %v466_v55, %v1195_v24  ;;  %v478_v62 = vrot.slane %v473_v56, %v1195_v24 }
  0x58   : > { %v499_v0 = vsel %vm493_vm2, 65537, %v1046_v63  ;;  %v500_v1 = vsel %vm494_vm3, 65537, %v1046_v63  ;;  %v485_v2 = vrot.slane %v480_v57, %v1195_v24  ;;  %v492_v3 = vrot.slane %v487_v58, %v1195_v24 }
  0x59   : > { %v805_v4 = vcombine.low %v499_v0, %v500_v1  ;;  %v806_v5 = vcombine.high %v499_v0, %v500_v1  ;;  %vm495_vm4 = vcmp.eq.bf16.partialorder %v471_v61, %v1203_v41  ;;  %vm496_vm5 = vcmp.eq.bf16.partialorder %v478_v62, %v1203_v41 }
  0x5a   : > { %v501_v6 = vsel %vm495_vm4, 65537, %v1046_v63  ;;  %v502_v7 = vsel %vm496_vm5, 65537, %v1046_v63  ;;  %vm497_vm6 = vcmp.eq.bf16.partialorder %v485_v2, %v1203_v41  ;;  %vm498_vm7 = vcmp.eq.bf16.partialorder %v492_v3, %v1203_v41 }
  0x5b   : > { %vm523_vm8 = vcmp.ne.s16.totalorder %v805_v4, 0  ;;  %vm524_vm9 = vcmp.ne.s16.totalorder %v806_v5, 0  ;;  %v807_v8 = vcombine.low %v501_v6, %v502_v7  ;;  %v808_v9 = vcombine.high %v501_v6, %v502_v7 }
  0x5c   : > { %v529_v10 = vsel %vm523_vm8, 65537, %v1046_v63  ;;  %v530_v11 = vsel %vm524_vm9, 65537, %v1046_v63  ;;  %v503_v12 = vsel %vm497_vm6, 65537, %v1046_v63  ;;  %v504_v13 = vsel %vm498_vm7, 65537, %v1046_v63 }
  0x5d   : > { %v536_v14 = vunpack.c.h.b16 %v529_v10  ;;  %v538_v15 = vunpack.c.h.b16 %v530_v11  ;;  %v535_v16 = vunpack.c.l.b16 %v529_v10  ;;  %v537_v17 = vunpack.c.l.b16 %v530_v11 }
  0x5e   : > { %vm525_vm10 = vcmp.ne.s16.totalorder %v807_v8, 0  ;;  %vm526_vm11 = vcmp.ne.s16.totalorder %v808_v9, 0  ;;  %v809_v18 = vcombine.low %v503_v12, %v504_v13  ;;  %v810_v19 = vcombine.high %v503_v12, %v504_v13 }
  0x5f   : > { %vm548_vm12 = vcmp.ne.s32.totalorder %v536_v14, 0  ;;  %vm550_vm13 = vcmp.ne.s32.totalorder %v538_v15, 0  ;;  %vm1245_vm14 = vcmp.ne.s32.totalorder %v535_v16, 0  ;;  %vm1249_vm15 = vcmp.ne.s32.totalorder %v537_v17, 0 }
  0x60   : > { %vm823_vm1 = vmpackc.low %vm550_vm13, %vm548_vm12  ;;  %v531_v22 = vsel %vm525_vm10, 65537, %v1046_v63  ;;  %v532_v23 = vsel %vm526_vm11, 65537, %v1046_v63  ;;  %vm527_vm2 = vcmp.ne.s16.totalorder %v809_v18, 0  ;;  %vm528_vm3 = vcmp.ne.s16.totalorder %v810_v19, 0 }
  0x61   : > { %851 = vmatprep.subr.msk.bf16.mxu1 %vm823_vm1, %v1047_v26  ;;  %vm825_vm4 = vmpackc.low %vm1249_vm15, %vm1245_vm14  ;;  %824 = vmatprep.subr.msk.bf16.mxu0 %vm823_vm1, %v1047_v26  ;;  %v540_v27 = vunpack.c.h.b16 %v531_v22  ;;  %v542_v28 = vunpack.c.h.b16 %v532_v23  ;;  %v539_v29 = vunpack.c.l.b16 %v531_v22  ;;  %v541_v30 = vunpack.c.l.b16 %v532_v23 }
  0x62   : > { %854 = vmatpush1.bf16.xpose.msk.msra.mxu1 %vm825_vm4, %v1047_v26  ;;  %826 = vmatpush1.bf16.xpose.msk.msra.mxu0 %vm825_vm4, %v1047_v26  ;;  %v533_v31 = vsel %vm527_vm2, 65537, %v1046_v63  ;;  %v534_v32 = vsel %vm528_vm3, 65537, %v1046_v63  ;;  %v278_v33 = vrot.slane %v273_v59, %v1195_v24  ;;  %v285_v34 = vrot.slane %v280_v60, %v1195_v24 }
  0x63   : > { %vm552_vm5 = vcmp.ne.s32.totalorder %v540_v27, 0  ;;  %vm554_vm6 = vcmp.ne.s32.totalorder %v542_v28, 0  ;;  %v783_v37 = vpack.i.b16 %v1209_v44, %v1209_v44  ;;  %vm1271_vm8 = vcmp.ne.s32.totalorder %v539_v29, 0  ;;  %v646_v27 = vld [vmem:[%s1181_s29] sm:$0xff]  ;;  %v649_v29 = vld [vmem:[%s1181_s29 + $0x18] sm:$0xff]  ;;  %v651_v44 = vld [vmem:[%s1181_s29 + $0x28] sm:$0xff] }
  0x64   : > { %vm827_vm7 = vmpackc.low %vm554_vm6, %vm552_vm5  ;;  %vm1275_vm9 = vcmp.ne.s32.totalorder %v541_v30, 0  ;;  %v544_v40 = vunpack.c.h.b16 %v533_v31  ;;  %v546_v42 = vunpack.c.h.b16 %v534_v32  ;;  %v543_v45 = vunpack.c.l.b16 %v533_v31  ;;  %v647_v31 = vld [vmem:[%s1181_s29 + $0x8] sm:$0xff] }
  0x65   : > { %852 = vmatprep.subr.msk.bf16.mxu1 %vm827_vm7, %v1047_v26  ;;  %828 = vmatprep.subr.msk.bf16.mxu0 %vm827_vm7, %v1047_v26  ;;  %vm302_vm10 = vcmp.eq.bf16.partialorder %v278_v33, %v1203_v41  ;;  %vm303_vm11 = vcmp.eq.bf16.partialorder %v285_v34, %v1203_v41  ;;  %v259_v36 = vpack.i.b16 %v1207_v43, %v1207_v43  ;;  %v545_v47 = vunpack.c.l.b16 %v534_v32  ;;  %vm829_vm14 = vmpackc.low %vm1275_vm9, %vm1271_vm8 }
  0x66   : > { %vm1285_vm12 = vcmp.ne.s32.totalorder %v544_v40, 0  ;;  %vm1289_vm13 = vcmp.ne.s32.totalorder %v546_v42, 0  ;;  %v308_v48 = vsel %vm302_vm10, 65537, %v1046_v63  ;;  %v309_v49 = vsel %vm303_vm11, 65537, %v1046_v63 }
  0x67   : > { %v264_v43 = vrot.slane %v259_v36, %v1195_v24  ;;  %v266_v50 = vpack.i.b16 %v241_v35, %v241_v35  ;;  %vm831_vm15 = vmpackc.low %vm1289_vm13, %vm1285_vm12  ;;  %v786_v51 = vcombine.low %v308_v48, %v309_v49  ;;  %v787_v52 = vcombine.high %v308_v48, %v309_v49 }
  0x68   : > { %v253_v53 = vrot.slane %v783_v37, %v1195_v24  ;;  %v257_v54 = vrot.slane %v783_v37, %v1197_v25  ;;  %vm1306_vm1 = vcmp.ne.s32.totalorder %v543_v45, 0  ;;  %vm1314_vm3 = vcmp.ne.s32.totalorder %v545_v47, 0  ;;  %v650_v45 = vld [vmem:[%s1181_s29 + $0x20] sm:$0xff] }
  0x69   : > { %v271_v56 = vrot.slane %v266_v50, %v1195_v24  ;;  %vm300_vm2 = vcmp.eq.bf16.partialorder %v264_v43, %v1203_v41  ;;  %vm332_vm4 = vcmp.ne.s16.totalorder %v786_v51, 0  ;;  %vm333_vm5 = vcmp.ne.s16.totalorder %v787_v52, 0  ;;  %vm833_vm7 = vmpackc.low %vm1314_vm3, %vm1306_vm1 }
  0x6a   : > { %855 = vmatpush1.bf16.xpose.msk.msra.mxu1 %vm829_vm14, %v1047_v26  ;;  %830 = vmatpush1.bf16.xpose.msk.msra.mxu0 %vm829_vm14, %v1047_v26  ;;  %v287_v58 = vpack.i.b16 %v253_v53, %v253_v53  ;;  %v338_v25 = vsel %vm332_vm4, 65537, %v1046_v63  ;;  %v339_v59 = vsel %vm333_vm5, 65537, %v1046_v63  ;;  %v294_v60 = vpack.i.b16 %v257_v54, %v257_v54 }
  0x6b   : > { %853 = vmatprep.subr.msk.bf16.mxu1 %vm831_vm15, %v1047_v26  ;;  %832 = vmatprep.subr.msk.bf16.mxu0 %vm831_vm15, %v1047_v26  ;;  %vm301_vm6 = vcmp.eq.bf16.partialorder %v271_v56, %v1203_v41  ;;  %v347_v61 = vunpack.c.h.b16 %v338_v25  ;;  %v349_v62 = vunpack.c.h.b16 %v339_v59  ;;  %v306_v0 = vsel %vm300_vm2, 65537, %v1046_v63 }
  0x6c   : > { %v307_v1 = vsel %vm301_vm6, 65537, %v1046_v63  ;;  %v292_v2 = vrot.slane %v287_v58, %v1195_v24  ;;  %v299_v3 = vrot.slane %v294_v60, %v1195_v24  ;;  %v346_v4 = vunpack.c.l.b16 %v338_v25 }
  0x6d   : > { %v348_v5 = vunpack.c.l.b16 %v339_v59  ;;  %vm359_vm8 = vcmp.ne.s32.totalorder %v347_v61, 0  ;;  %vm361_vm9 = vcmp.ne.s32.totalorder %v349_v62, 0  ;;  %v784_v6 = vcombine.low %v306_v0, %v307_v1 }
  0x6e   : > { %vm839_vm10 = vmpackc.low %vm361_vm9, %vm359_vm8  ;;  %v785_v7 = vcombine.high %v306_v0, %v307_v1  ;;  %vm304_vm11 = vcmp.eq.bf16.partialorder %v292_v2, %v1203_v41  ;;  %vm305_vm12 = vcmp.eq.bf16.partialorder %v299_v3, %v1203_v41  ;;  %vm1348_vm15 = vcmp.ne.s32.totalorder %v346_v4, 0 }
  0x6f   : > { %840 = vmatprep.mubr.msk.bf16.mxu1 %vm839_vm10, %v1047_v26  ;;  %v310_v24 = vsel %vm304_vm11, 65537, %v1046_v63  ;;  %v311_v8 = vsel %vm305_vm12, 65537, %v1046_v63  ;;  %vm330_vm13 = vcmp.ne.s16.totalorder %v784_v6, 0  ;;  %vm1352_vm2 = vcmp.ne.s32.totalorder %v348_v5, 0 }
  0x70   : > { %vm331_vm14 = vcmp.ne.s16.totalorder %v785_v7, 0  ;;  %v788_v9 = vcombine.low %v310_v24, %v311_v8  ;;  %v789_v10 = vcombine.high %v310_v24, %v311_v8  ;;  %v336_v12 = vsel %vm330_vm13, 65537, %v1046_v63  ;;  %vm841_vm1 = vmpackc.low %vm1352_vm2, %vm1348_vm15 }
  0x71   : > { %v337_v13 = vsel %vm331_vm14, 65537, %v1046_v63  ;;  %v342_v14 = vunpack.c.l.b16 %v336_v12  ;;  %v343_v15 = vunpack.c.h.b16 %v336_v12 }
  0x72   : > { %856 = vmatpush1.bf16.xpose.msk.msra.mxu1 %vm833_vm7, %v1047_v26  ;;  %834 = vmatpush1.bf16.xpose.msk.msra.mxu0 %vm833_vm7, %v1047_v26  ;;  %v344_v16 = vunpack.c.l.b16 %v337_v13  ;;  %v345_v17 = vunpack.c.h.b16 %v337_v13  ;;  %vm334_vm4 = vcmp.ne.s16.totalorder %v788_v9, 0  ;;  %vm335_vm5 = vcmp.ne.s16.totalorder %v789_v10, 0 }
  0x73   : > { %vm355_vm3 = vcmp.ne.s32.totalorder %v343_v15, 0  ;;  %vm354_vm7 = vcmp.ne.s32.totalorder %v342_v14, 0  ;;  %v340_v18 = vsel %vm334_vm4, 65537, %v1046_v63  ;;  %v341_v19 = vsel %vm335_vm5, 65537, %v1046_v63  ;;  %v648_v63 = vld [vmem:[%s1181_s29 + $0x10] sm:$0xff] }
  0x74   : > { %vm357_vm6 = vcmp.ne.s32.totalorder %v345_v17, 0  ;;  %vm356_vm8 = vcmp.ne.s32.totalorder %v344_v16, 0  ;;  %v351_v20 = vunpack.c.h.b16 %v340_v18  ;;  %v353_v21 = vunpack.c.h.b16 %v341_v19 }
  0x75   : > { %vm835_vm9 = vmpackc.low %vm357_vm6, %vm355_vm3  ;;  %v350_v22 = vunpack.c.l.b16 %v340_v18  ;;  %v352_v23 = vunpack.c.l.b16 %v341_v19 }
  0x76   : > { %836 = vmatprep.mubr.msk.bf16.mxu0 %vm835_vm9, %v1047_v26  ;;  %vm837_vm10 = vmpackc.low %vm356_vm8, %vm354_vm7  ;;  %vm363_vm11 = vcmp.ne.s32.totalorder %v351_v20, 0  ;;  %vm365_vm12 = vcmp.ne.s32.totalorder %v353_v21, 0 }
  0x77   : > { %vm843_vm13 = vmpackc.low %vm365_vm12, %vm363_vm11  ;;  %vm362_vm14 = vcmp.ne.s32.totalorder %v350_v22, 0  ;;  %vm364_vm15 = vcmp.ne.s32.totalorder %v352_v23, 0 }
  0x78   : > { %vm845_vm2 = vmpackc.low %vm364_vm15, %vm362_vm14 }
  0x79   : > { %842 = vmatmul.mubr.msk.bf16.vlgmr.msra.gmra.mrb[0].mxu1 %vm841_vm1, %v1047_v26  ;;  %838 = vmatmul.mubr.msk.bf16.vlgmr.msra.gmra.mrb[0].mxu0 %vm837_vm10, %v1047_v26 }
  0x7a   : > { %844 = vmatprep.mubr.msk.bf16.mxu1 %vm843_vm13, %v1047_v26 }
  0x81   : > { %846 = vmatmul.mubr.msk.bf16.gmra.mrb[4].mxu1 %vm845_vm2, %v1047_v26 }
 0x14c   : > { %v631_v28 = vpop.f32.mrb[0].mxu1  ;;  %v623_v30 = vpop.f32.mrb[0].mxu0 }
 0x14d   : > { %v654_v32 = vadd.f32 %v648_v63, %v631_v28  ;;  %v633_v33 = vpop.f32.mrb[1].mxu1  ;;  %v652_v34 = vadd.f32 %v646_v27, %v623_v30  ;;  %v625_v35 = vpop.f32.mrb[1].mxu0 }
 0x14e   : > { %v634_v37 = vpop.f32.mrb[2].mxu1  ;;  %v626_v38 = vpop.f32.mrb[2].mxu0 }
 0x14f   : > { %661 = vst.msk [vmem:[%s1181_s29 + $0x10] sm:$0xff] %vm170_vm0, %v654_v32  ;;  %v655_v26 = vadd.f32 %v649_v29, %v634_v37  ;;  %v636_v39 = vpop.f32.mrb[3].mxu1  ;;  %659 = vst.msk [vmem:[%s1181_s29] sm:$0xff] %vm170_vm0, %v652_v34  ;;  %v653_v40 = vadd.f32 %v647_v31, %v626_v38  ;;  %v628_v42 = vpop.f32.mrb[3].mxu0 }
 0x151   : > { %662 = vst.msk [vmem:[%s1181_s29 + $0x18] sm:$0xff] %vm170_vm0, %v655_v26  ;;  %660 = vst.msk [vmem:[%s1181_s29 + $0x8] sm:$0xff] %vm170_vm0, %v653_v40 }
 0x154   : > { %v639_v36 = vpop.f32.mrb[4].mxu1 }
 0x155   : > { %v656_v46 = vadd.f32 %v650_v45, %v639_v36  ;;  %v641_v47 = vpop.f32.mrb[5].mxu1 }
 0x156   : > { %v642_v48 = vpop.f32.mrb[6].mxu1 }
 0x157   : > { %663 = vst.msk [vmem:[%s1181_s29 + $0x20] sm:$0xff] %vm170_vm0, %v656_v46  ;;  %v657_v49 = vadd.f32 %v651_v44, %v642_v48  ;;  %v644_v43 = vpop.f32.mrb[7].mxu1 }
 0x159   : > { %664 = vst.msk [vmem:[%s1181_s29 + $0x28] sm:$0xff] %vm170_vm0, %v657_v49 }
 0x15a   : > { %972 = shalt.err (!%p969_p6)
}
 0x15b   : > { %s973_s16 = scalar_lea.hbm %s1388_s4, 768  ;;  %s977_s23 = scalar_lea.hbm %s1444_s1, 1536 }
 0x15c   : > { %p974_p4 = scmp.ne.s32.totalorder %s1388_s4, %s973_s16  ;;  %p978_p1 = scmp.lt.u32.totalorder %s1388_s4, %s1444_s1 }
 0x15d   : > { %p979_p2 = scmp.lt.u32.totalorder %s977_s23, %s973_s16  ;;  %p981_p8 = scmp.lt.u32.totalorder %s973_s16, %s1388_s4 }
 0x15e   : > { %p975_p10 = pnand %p974_p4, %p1473_p9 }
 0x15f   : > { %p980_p5 = por %p979_p2, %p978_p1 }
 0x160   : > { %p976_p12 = pneg %p975_p10 }
 0x161   : > { %p982_p11 = por %p981_p8, %p980_p5 }
 0x163   : > { %p983_p0 = pnand %p982_p11, %p976_p12 }
 0x165   : > { %986 = shalt.err (!%p983_p0)
}
 0x166   : > { %s1049_s28 = smov 128   ;;  %s1050_s27 = smov 8  }
 0x167   : > { %863 = dma.vmem_to_hbm [thread:$0]  (%p1473_p9), %s1390_s30, 768, %s1388_s4, %s666_s9, %s1049_s28, %s1049_s28, %s1050_s27  }
 0x168 PF: > { %s696_s29 = sand.u32 1, %s1021_s6   ;;  %p1474_p7 = scmp.ne.s32.totalorder %s1449_s21, 0 }
 0x169   : > { %p1475_p13 = scmp.ge.s32.totalorder %s1041_s11, 2  ;;  %s697_s18 = scalar_lea.sflag [#allocation4], %s696_s29 }
 0x16b   : > { %p870_p3 = pnand %p1475_p13, %p1474_p7 }
 0x16d   : > { %1016 = dma.done.wait (!%p870_p3), %s697_s18, 768  }
 0x16e   : > { %1018 = vsyncadd (!%p870_p3), %s697_s18, 4294966528  ;;  %s17_s11 = sadd.s32 1, %s1041_s11   ;;  %s1476_s6 = smov %s1025_s7 }
 0x16f   : > { %p14_p6 = scmp.ge.s32.totalorder %s17_s11, 4   ;;  %s1477_s7 = smov %s1029_s8 }
 0x170   : > { %s1478_s8 = smov %s1117_s20  ;;  %s1479_s9 = smov %s1037_s10 }
 0x171   : > { %s1480_s10 = smov %s1482_s14  ;;  %16 = sbr.rel (!%p14_p6) target bundleno = 6 (0x6), region = 73 }
 0x178   :  { %702 = vsyncpa [#allocation3], 1 }
 0x179   :  { %704 = vsyncpa [#allocation3 + $0x1], 1 }
 0x17a   :  { %705 = vsyncpa [#allocation4], 1 }
 0x17b   :  { %707 = vsyncpa [#allocation4 + $0x1], 1 }

</bundles_post_ra>
